<compile_context>
chip_gen: v6e
topology: v6e:2x2x1
jax: 0.10.0
libtpu: 0.0.40
codegen_flags: <defaults>
</compile_context>

<pallas_src>
import functools

import jax
import jax.numpy as jnp
from jax import lax
from jax.experimental import pallas as pl
from jax.experimental.pallas import tpu as pltpu


def _round_up(x: int, m: int) -> int:
    return ((x + m - 1) // m) * m


def _gather_kernel(num_inflight, ids_ref, table_ref, out_ref, row_buf, sem):
    # ids_ref:   (n_pad,) int32 in SMEM (scalar-prefetch)
    # table_ref: (V, D) embedding table, resident in HBM (memory_space=pl.ANY)
    # out_ref:   (t, D) pipelined VMEM output tile
    # row_buf:   (t, D) VMEM scratch the row DMAs land in
    # sem:       (num_inflight,) DMA semaphores (rotating slots)
    t = out_ref.shape[0]
    k = num_inflight
    base = pl.program_id(0) * t

    def start_copy(j, slot):
        row = ids_ref[base + j]                       # SMEM scalar read
        pltpu.make_async_copy(
            table_ref.at[pl.ds(row, 1), :],           # HBM row (1, D)
            row_buf.at[pl.ds(j, 1), :],               # VMEM row (1, D)
            sem.at[slot],
        ).start()

    def wait_copy(j, slot):
        # Only the dst size + semaphore matter for the wait; src index is dummy.
        pltpu.make_async_copy(
            table_ref.at[pl.ds(0, 1), :],
            row_buf.at[pl.ds(j, 1), :],
            sem.at[slot],
        ).wait()

    # Prime the pipeline with up to k outstanding row DMAs (static unroll).
    for j in range(k):
        start_copy(j, j)

    # Steady state: wait for row j, then refill its semaphore slot with row j+k.
    @pl.loop(0, t)
    def _(j):
        slot = j % k
        wait_copy(j, slot)

        @pl.when(j + k < t)
        def _():
            start_copy(j + k, slot)

    out_ref[...] = row_buf[...]


def token_embedding(ids, emb_table, *, tile_tokens=256, max_inflight=8):
    """ids: int [B, S]; emb_table: [V, D] (f32 or bf16) -> [B, S, D]."""
    B, S = ids.shape
    V, D = emb_table.shape
    N = B * S
    itemsize = jnp.dtype(emb_table.dtype).itemsize

    # Token tile: multiple of 8 rows (16 for packed dtypes such as bf16),
    # never larger than the padded token count so tiny inputs stay tiny.
    row_mult = 8 if itemsize >= 4 else 16
    t = min(tile_tokens, _round_up(N, row_mult))
    t = _round_up(t, row_mult)
    n_pad = _round_up(N, t)
    num_tiles = n_pad // t
    k = min(max_inflight, t)

    # Clamp so out-of-range ids can't issue an OOB HBM DMA (nn.Embedding would
    # raise instead -- documented divergence). Pad with id 0 (valid row).
    ids_flat = jnp.clip(ids.reshape(N).astype(jnp.int32), 0, V - 1)
    if n_pad != N:
        ids_flat = jnp.pad(ids_flat, (0, n_pad - N))

    # VMEM: row buffer + double-buffered output tile + headroom. The table
    # never enters VMEM. Clamp to the actual chip generation's capacity.
    vmem_budget = 3 * t * D * itemsize + (2 << 20)
    try:
        cap = int(getattr(pltpu.get_tpu_info(), "vmem_capacity_bytes", 64 << 20))
    except Exception:  # pragma: no cover - CPU/interpret fallback
        cap = 64 << 20
    vmem_limit = int(min(max(vmem_budget, 16 << 20), int(0.9 * cap)))

    cost = pl.CostEstimate(
        flops=0,
        transcendentals=0,
        bytes_accessed=n_pad * 4 + 2 * n_pad * D * itemsize,
    )

    out_flat = pl.pallas_call(
        functools.partial(_gather_kernel, k),
        out_shape=jax.ShapeDtypeStruct((n_pad, D), emb_table.dtype),
        grid_spec=pltpu.PrefetchScalarGridSpec(
            num_scalar_prefetch=1,                      # ids -> SMEM
            grid=(num_tiles,),
            in_specs=[pl.BlockSpec(memory_space=pl.ANY)],   # table stays in HBM
            out_specs=pl.BlockSpec((t, D), lambda i, ids: (i, 0)),
            scratch_shapes=[
                pltpu.VMEM((t, D), emb_table.dtype),
                pltpu.SemaphoreType.DMA((k,)),
            ],
        ),
        compiler_params=pltpu.CompilerParams(
            dimension_semantics=("parallel",),          # shards across TCs on v7x
            vmem_limit_bytes=vmem_limit,
        ),
        cost_estimate=cost,
    )(ids_flat, emb_table)

    return out_flat[:N].reshape(B, S, D)


if __name__ == "__main__":
    vocab_size = 64
    d_model = 128
    batch = 2
    seq = 8

    key = jax.random.PRNGKey(0)
    k_emb, k_ids = jax.random.split(key)

    # nn.Embedding default init: weight ~ N(0, 1)
    emb_table = jax.random.normal(k_emb, (vocab_size, d_model), dtype=jnp.float32)
    ids = jax.random.randint(k_ids, (batch, seq), 0, vocab_size, dtype=jnp.int32)

    out = token_embedding(ids, emb_table)
    out = jax.block_until_ready(out)

    # Reference check (plain JAX gather). DMA gather is an exact copy.
    ref = emb_table[ids]
    assert out.shape == (batch, seq, d_model)
    assert jnp.allclose(out, ref, atol=0.0), "mismatch vs reference gather"

    print("KERNEL_OK")
</pallas_src>

<mosaic_0001>
module attributes {stable_mosaic.version = 11 : i64} {
  func.func @_gather_kernel(%arg0: i32, %arg1: memref<16xi32, #tpu.memory_space<smem>>, %arg2: memref<64x128xf32, #tpu.memory_space<any>>, %arg3: memref<16x128xf32, #tpu.memory_space<vmem>>, %arg4: memref<16x128xf32, #tpu.memory_space<vmem>>, %arg5: memref<8x!tpu.dma_semaphore, #tpu.memory_space<semaphore_mem>>) attributes {dimension_semantics = [#tpu.dimension_semantics<parallel>], iteration_bounds = array<i64: 1>, scalar_prefetch = 1 : i64, scratch_operands = 2 : i64, tpu.core_type = #tpu.core_type<tc>, window_params = [{}, {transform_indices = @transform_1, window_bounds = array<i64: 16, 128>}]} {
    %c16_i32 = arith.constant 16 : i32
    %0 = arith.muli %arg0, %c16_i32 : i32
    %c0_i32 = arith.constant 0 : i32
    %1 = arith.addi %0, %c0_i32 : i32
    %2 = arith.index_cast %1 : i32 to index
    %3 = memref.load %arg1[%2] : memref<16xi32, #tpu.memory_space<smem>>
    %c0_i32_0 = arith.constant 0 : i32
    %c0_i32_1 = arith.constant 0 : i32
    %4 = tpu.memref_slice %arg2[%3, %c0_i32_1] : memref<64x128xf32, #tpu.memory_space<any>> -> memref<1x128xf32, #tpu.memory_space<any>>
    %c0_i32_2 = arith.constant 0 : i32
    %c0_i32_3 = arith.constant 0 : i32
    %5 = tpu.memref_slice %arg4[%c0_i32_2, %c0_i32_3] : memref<16x128xf32, #tpu.memory_space<vmem>> -> memref<1x128xf32, #tpu.memory_space<vmem>>
    %6 = tpu.memref_slice %arg5[%c0_i32_0] : memref<8x!tpu.dma_semaphore, #tpu.memory_space<semaphore_mem>> -> memref<1x!tpu.dma_semaphore, #tpu.memory_space<semaphore_mem>>
    %7 = tpu.memref_squeeze %6 : memref<1x!tpu.dma_semaphore, #tpu.memory_space<semaphore_mem>> -> memref<!tpu.dma_semaphore, #tpu.memory_space<semaphore_mem>>
    tpu.enqueue_dma source(%4 : memref<1x128xf32, #tpu.memory_space<any>>) target(%5 : memref<1x128xf32, #tpu.memory_space<vmem>>) target_semaphore(%7 : memref<!tpu.dma_semaphore, #tpu.memory_space<semaphore_mem>>)
    %c1_i32 = arith.constant 1 : i32
    %8 = arith.addi %0, %c1_i32 : i32
    %9 = arith.index_cast %8 : i32 to index
    %10 = memref.load %arg1[%9] : memref<16xi32, #tpu.memory_space<smem>>
    %c1_i32_4 = arith.constant 1 : i32
    %c0_i32_5 = arith.constant 0 : i32
    %11 = tpu.memref_slice %arg2[%10, %c0_i32_5] : memref<64x128xf32, #tpu.memory_space<any>> -> memref<1x128xf32, #tpu.memory_space<any>>
    %c1_i32_6 = arith.constant 1 : i32
    %c0_i32_7 = arith.constant 0 : i32
    %12 = tpu.memref_slice %arg4[%c1_i32_6, %c0_i32_7] : memref<16x128xf32, #tpu.memory_space<vmem>> -> memref<1x128xf32, #tpu.memory_space<vmem>>
    %13 = tpu.memref_slice %arg5[%c1_i32_4] : memref<8x!tpu.dma_semaphore, #tpu.memory_space<semaphore_mem>> -> memref<1x!tpu.dma_semaphore, #tpu.memory_space<semaphore_mem>>
    %14 = tpu.memref_squeeze %13 : memref<1x!tpu.dma_semaphore, #tpu.memory_space<semaphore_mem>> -> memref<!tpu.dma_semaphore, #tpu.memory_space<semaphore_mem>>
    tpu.enqueue_dma source(%11 : memref<1x128xf32, #tpu.memory_space<any>>) target(%12 : memref<1x128xf32, #tpu.memory_space<vmem>>) target_semaphore(%14 : memref<!tpu.dma_semaphore, #tpu.memory_space<semaphore_mem>>)
    %c2_i32 = arith.constant 2 : i32
    %15 = arith.addi %0, %c2_i32 : i32
    %16 = arith.index_cast %15 : i32 to index
    %17 = memref.load %arg1[%16] : memref<16xi32, #tpu.memory_space<smem>>
    %c2_i32_8 = arith.constant 2 : i32
    %c0_i32_9 = arith.constant 0 : i32
    %18 = tpu.memref_slice %arg2[%17, %c0_i32_9] : memref<64x128xf32, #tpu.memory_space<any>> -> memref<1x128xf32, #tpu.memory_space<any>>
    %c2_i32_10 = arith.constant 2 : i32
    %c0_i32_11 = arith.constant 0 : i32
    %19 = tpu.memref_slice %arg4[%c2_i32_10, %c0_i32_11] : memref<16x128xf32, #tpu.memory_space<vmem>> -> memref<1x128xf32, #tpu.memory_space<vmem>>
    %20 = tpu.memref_slice %arg5[%c2_i32_8] : memref<8x!tpu.dma_semaphore, #tpu.memory_space<semaphore_mem>> -> memref<1x!tpu.dma_semaphore, #tpu.memory_space<semaphore_mem>>
    %21 = tpu.memref_squeeze %20 : memref<1x!tpu.dma_semaphore, #tpu.memory_space<semaphore_mem>> -> memref<!tpu.dma_semaphore, #tpu.memory_space<semaphore_mem>>
    tpu.enqueue_dma source(%18 : memref<1x128xf32, #tpu.memory_space<any>>) target(%19 : memref<1x128xf32, #tpu.memory_space<vmem>>) target_semaphore(%21 : memref<!tpu.dma_semaphore, #tpu.memory_space<semaphore_mem>>)
    %c3_i32 = arith.constant 3 : i32
    %22 = arith.addi %0, %c3_i32 : i32
    %23 = arith.index_cast %22 : i32 to index
    %24 = memref.load %arg1[%23] : memref<16xi32, #tpu.memory_space<smem>>
    %c3_i32_12 = arith.constant 3 : i32
    %c0_i32_13 = arith.constant 0 : i32
    %25 = tpu.memref_slice %arg2[%24, %c0_i32_13] : memref<64x128xf32, #tpu.memory_space<any>> -> memref<1x128xf32, #tpu.memory_space<any>>
    %c3_i32_14 = arith.constant 3 : i32
    %c0_i32_15 = arith.constant 0 : i32
    %26 = tpu.memref_slice %arg4[%c3_i32_14, %c0_i32_15] : memref<16x128xf32, #tpu.memory_space<vmem>> -> memref<1x128xf32, #tpu.memory_space<vmem>>
    %27 = tpu.memref_slice %arg5[%c3_i32_12] : memref<8x!tpu.dma_semaphore, #tpu.memory_space<semaphore_mem>> -> memref<1x!tpu.dma_semaphore, #tpu.memory_space<semaphore_mem>>
    %28 = tpu.memref_squeeze %27 : memref<1x!tpu.dma_semaphore, #tpu.memory_space<semaphore_mem>> -> memref<!tpu.dma_semaphore, #tpu.memory_space<semaphore_mem>>
    tpu.enqueue_dma source(%25 : memref<1x128xf32, #tpu.memory_space<any>>) target(%26 : memref<1x128xf32, #tpu.memory_space<vmem>>) target_semaphore(%28 : memref<!tpu.dma_semaphore, #tpu.memory_space<semaphore_mem>>)
    %c4_i32 = arith.constant 4 : i32
    %29 = arith.addi %0, %c4_i32 : i32
    %30 = arith.index_cast %29 : i32 to index
    %31 = memref.load %arg1[%30] : memref<16xi32, #tpu.memory_space<smem>>
    %c4_i32_16 = arith.constant 4 : i32
    %c0_i32_17 = arith.constant 0 : i32
    %32 = tpu.memref_slice %arg2[%31, %c0_i32_17] : memref<64x128xf32, #tpu.memory_space<any>> -> memref<1x128xf32, #tpu.memory_space<any>>
    %c4_i32_18 = arith.constant 4 : i32
    %c0_i32_19 = arith.constant 0 : i32
    %33 = tpu.memref_slice %arg4[%c4_i32_18, %c0_i32_19] : memref<16x128xf32, #tpu.memory_space<vmem>> -> memref<1x128xf32, #tpu.memory_space<vmem>>
    %34 = tpu.memref_slice %arg5[%c4_i32_16] : memref<8x!tpu.dma_semaphore, #tpu.memory_space<semaphore_mem>> -> memref<1x!tpu.dma_semaphore, #tpu.memory_space<semaphore_mem>>
    %35 = tpu.memref_squeeze %34 : memref<1x!tpu.dma_semaphore, #tpu.memory_space<semaphore_mem>> -> memref<!tpu.dma_semaphore, #tpu.memory_space<semaphore_mem>>
    tpu.enqueue_dma source(%32 : memref<1x128xf32, #tpu.memory_space<any>>) target(%33 : memref<1x128xf32, #tpu.memory_space<vmem>>) target_semaphore(%35 : memref<!tpu.dma_semaphore, #tpu.memory_space<semaphore_mem>>)
    %c5_i32 = arith.constant 5 : i32
    %36 = arith.addi %0, %c5_i32 : i32
    %37 = arith.index_cast %36 : i32 to index
    %38 = memref.load %arg1[%37] : memref<16xi32, #tpu.memory_space<smem>>
    %c5_i32_20 = arith.constant 5 : i32
    %c0_i32_21 = arith.constant 0 : i32
    %39 = tpu.memref_slice %arg2[%38, %c0_i32_21] : memref<64x128xf32, #tpu.memory_space<any>> -> memref<1x128xf32, #tpu.memory_space<any>>
    %c5_i32_22 = arith.constant 5 : i32
    %c0_i32_23 = arith.constant 0 : i32
    %40 = tpu.memref_slice %arg4[%c5_i32_22, %c0_i32_23] : memref<16x128xf32, #tpu.memory_space<vmem>> -> memref<1x128xf32, #tpu.memory_space<vmem>>
    %41 = tpu.memref_slice %arg5[%c5_i32_20] : memref<8x!tpu.dma_semaphore, #tpu.memory_space<semaphore_mem>> -> memref<1x!tpu.dma_semaphore, #tpu.memory_space<semaphore_mem>>
    %42 = tpu.memref_squeeze %41 : memref<1x!tpu.dma_semaphore, #tpu.memory_space<semaphore_mem>> -> memref<!tpu.dma_semaphore, #tpu.memory_space<semaphore_mem>>
    tpu.enqueue_dma source(%39 : memref<1x128xf32, #tpu.memory_space<any>>) target(%40 : memref<1x128xf32, #tpu.memory_space<vmem>>) target_semaphore(%42 : memref<!tpu.dma_semaphore, #tpu.memory_space<semaphore_mem>>)
    %c6_i32 = arith.constant 6 : i32
    %43 = arith.addi %0, %c6_i32 : i32
    %44 = arith.index_cast %43 : i32 to index
    %45 = memref.load %arg1[%44] : memref<16xi32, #tpu.memory_space<smem>>
    %c6_i32_24 = arith.constant 6 : i32
    %c0_i32_25 = arith.constant 0 : i32
    %46 = tpu.memref_slice %arg2[%45, %c0_i32_25] : memref<64x128xf32, #tpu.memory_space<any>> -> memref<1x128xf32, #tpu.memory_space<any>>
    %c6_i32_26 = arith.constant 6 : i32
    %c0_i32_27 = arith.constant 0 : i32
    %47 = tpu.memref_slice %arg4[%c6_i32_26, %c0_i32_27] : memref<16x128xf32, #tpu.memory_space<vmem>> -> memref<1x128xf32, #tpu.memory_space<vmem>>
    %48 = tpu.memref_slice %arg5[%c6_i32_24] : memref<8x!tpu.dma_semaphore, #tpu.memory_space<semaphore_mem>> -> memref<1x!tpu.dma_semaphore, #tpu.memory_space<semaphore_mem>>
    %49 = tpu.memref_squeeze %48 : memref<1x!tpu.dma_semaphore, #tpu.memory_space<semaphore_mem>> -> memref<!tpu.dma_semaphore, #tpu.memory_space<semaphore_mem>>
    tpu.enqueue_dma source(%46 : memref<1x128xf32, #tpu.memory_space<any>>) target(%47 : memref<1x128xf32, #tpu.memory_space<vmem>>) target_semaphore(%49 : memref<!tpu.dma_semaphore, #tpu.memory_space<semaphore_mem>>)
    %c7_i32 = arith.constant 7 : i32
    %50 = arith.addi %0, %c7_i32 : i32
    %51 = arith.index_cast %50 : i32 to index
    %52 = memref.load %arg1[%51] : memref<16xi32, #tpu.memory_space<smem>>
    %c7_i32_28 = arith.constant 7 : i32
    %c0_i32_29 = arith.constant 0 : i32
    %53 = tpu.memref_slice %arg2[%52, %c0_i32_29] : memref<64x128xf32, #tpu.memory_space<any>> -> memref<1x128xf32, #tpu.memory_space<any>>
    %c7_i32_30 = arith.constant 7 : i32
    %c0_i32_31 = arith.constant 0 : i32
    %54 = tpu.memref_slice %arg4[%c7_i32_30, %c0_i32_31] : memref<16x128xf32, #tpu.memory_space<vmem>> -> memref<1x128xf32, #tpu.memory_space<vmem>>
    %55 = tpu.memref_slice %arg5[%c7_i32_28] : memref<8x!tpu.dma_semaphore, #tpu.memory_space<semaphore_mem>> -> memref<1x!tpu.dma_semaphore, #tpu.memory_space<semaphore_mem>>
    %56 = tpu.memref_squeeze %55 : memref<1x!tpu.dma_semaphore, #tpu.memory_space<semaphore_mem>> -> memref<!tpu.dma_semaphore, #tpu.memory_space<semaphore_mem>>
    tpu.enqueue_dma source(%53 : memref<1x128xf32, #tpu.memory_space<any>>) target(%54 : memref<1x128xf32, #tpu.memory_space<vmem>>) target_semaphore(%56 : memref<!tpu.dma_semaphore, #tpu.memory_space<semaphore_mem>>)
    %c0_i32_32 = arith.constant 0 : i32
    %c16_i32_33 = arith.constant 16 : i32
    %57 = arith.addi %c0_i32_32, %c16_i32_33 : i32
    %c1_i32_34 = arith.constant 1 : i32
    scf.for %arg6 = %c0_i32_32 to %57 step %c1_i32_34  : i32 {
      %c1_i32_39 = arith.constant 1 : i32
      %60 = arith.muli %arg6, %c1_i32_39 : i32
      %c0_i32_40 = arith.constant 0 : i32
      %61 = arith.addi %c0_i32_40, %60 : i32
      %c8_i32 = arith.constant 8 : i32
      %c0_i32_41 = arith.constant 0 : i32
      %62 = arith.cmpi eq, %c8_i32, %c0_i32_41 : i32
      %c1_i32_42 = arith.constant 1 : i32
      %63 = arith.select %62, %c1_i32_42, %c8_i32 : i32
      %64 = arith.remsi %61, %63 : i32
      %c0_i32_43 = arith.constant 0 : i32
      %65 = arith.cmpi ne, %64, %c0_i32_43 : i32
      %c0_i32_44 = arith.constant 0 : i32
      %66 = arith.cmpi slt, %64, %c0_i32_44 : i32
      %c0_i32_45 = arith.constant 0 : i32
      %67 = arith.cmpi slt, %63, %c0_i32_45 : i32
      %68 = arith.xori %66, %67 : i1
      %69 = arith.andi %68, %65 : i1
      %70 = arith.addi %64, %63 : i32
      %71 = arith.select %69, %70, %64 : i32
      %c0_i32_46 = arith.constant 0 : i32
      %c0_i32_47 = arith.constant 0 : i32
      %72 = tpu.memref_slice %arg2[%c0_i32_46, %c0_i32_47] : memref<64x128xf32, #tpu.memory_space<any>> -> memref<1x128xf32, #tpu.memory_space<any>>
      %c0_i32_48 = arith.constant 0 : i32
      %73 = tpu.memref_slice %arg4[%61, %c0_i32_48] : memref<16x128xf32, #tpu.memory_space<vmem>> -> memref<1x128xf32, #tpu.memory_space<vmem>>
      %74 = tpu.memref_slice %arg5[%71] : memref<8x!tpu.dma_semaphore, #tpu.memory_space<semaphore_mem>> -> memref<1x!tpu.dma_semaphore, #tpu.memory_space<semaphore_mem>>
      %75 = tpu.memref_squeeze %74 : memref<1x!tpu.dma_semaphore, #tpu.memory_space<semaphore_mem>> -> memref<!tpu.dma_semaphore, #tpu.memory_space<semaphore_mem>>
      tpu.wait_dma2 semaphore(%75 : memref<!tpu.dma_semaphore, #tpu.memory_space<semaphore_mem>>) src(%72 : memref<1x128xf32, #tpu.memory_space<any>>) dst(%73 : memref<1x128xf32, #tpu.memory_space<vmem>>)
      %c8_i32_49 = arith.constant 8 : i32
      %76 = arith.addi %61, %c8_i32_49 : i32
      %c16_i32_50 = arith.constant 16 : i32
      %77 = arith.cmpi slt, %76, %c16_i32_50 : i32
      %78 = arith.extui %77 : i1 to i32
      %c0_i32_51 = arith.constant 0 : i32
      %79 = arith.cmpi ne, %78, %c0_i32_51 : i32
      scf.if %79 {
        %c8_i32_52 = arith.constant 8 : i32
        %80 = arith.addi %61, %c8_i32_52 : i32
        %81 = arith.addi %0, %80 : i32
        %82 = arith.index_cast %81 : i32 to index
        %83 = memref.load %arg1[%82] : memref<16xi32, #tpu.memory_space<smem>>
        %c0_i32_53 = arith.constant 0 : i32
        %84 = tpu.memref_slice %arg2[%83, %c0_i32_53] : memref<64x128xf32, #tpu.memory_space<any>> -> memref<1x128xf32, #tpu.memory_space<any>>
        %c0_i32_54 = arith.constant 0 : i32
        %85 = tpu.memref_slice %arg4[%80, %c0_i32_54] : memref<16x128xf32, #tpu.memory_space<vmem>> -> memref<1x128xf32, #tpu.memory_space<vmem>>
        %86 = tpu.memref_slice %arg5[%71] : memref<8x!tpu.dma_semaphore, #tpu.memory_space<semaphore_mem>> -> memref<1x!tpu.dma_semaphore, #tpu.memory_space<semaphore_mem>>
        %87 = tpu.memref_squeeze %86 : memref<1x!tpu.dma_semaphore, #tpu.memory_space<semaphore_mem>> -> memref<!tpu.dma_semaphore, #tpu.memory_space<semaphore_mem>>
        tpu.enqueue_dma source(%84 : memref<1x128xf32, #tpu.memory_space<any>>) target(%85 : memref<1x128xf32, #tpu.memory_space<vmem>>) target_semaphore(%87 : memref<!tpu.dma_semaphore, #tpu.memory_space<semaphore_mem>>)
      } else {
      }
    }
    %c16_i32_35 = arith.constant 16 : i32
    %c0 = arith.constant 0 : index
    %c0_36 = arith.constant 0 : index
    %58 = vector.load %arg4[%c0, %c0_36] : memref<16x128xf32, #tpu.memory_space<vmem>>, vector<16x128xf32>
    %c0_37 = arith.constant 0 : index
    %c0_38 = arith.constant 0 : index
    %59 = vector.load %arg3[%c0_37, %c0_38] : memref<16x128xf32, #tpu.memory_space<vmem>>, vector<16x128xf32>
    tpu.vector_store %arg3[%c0_37, %c0_38], %58 {strides = array<i32>} : memref<16x128xf32, #tpu.memory_space<vmem>>, vector<16x128xf32>,
    return
  }
  func.func @transform_1(%arg0: i32, %arg1: memref<16xi32, #tpu.memory_space<smem>>) -> (i32, i32) {
    %c0_i32 = arith.constant 0 : i32
    %c0_i32_0 = arith.constant 0 : i32
    return %arg0, %c0_i32 : i32, i32
  }
}

</mosaic_0001>

<bundles_post_ra>
// kernel: tpu_custom_call.1
= control target key start
LH: loop header
LB: loop body
LE: loop exit
PB: predicated region body
PF: predicated region fallthrough
CT: control target
= control target key end

     0   :  { %s587_s9 = smov [#allocation5]   ;;  %s783_s0 = inlined_call_operand.hbm [shape: s32[16], index: 0, kind: input, shape index: {}]   ;;  %s784_s1 = inlined_call_operand.hbm [shape: f32[64,128], index: 1, kind: input, shape index: {}]   ;;  %s785_s2 = inlined_call_operand.hbm [shape: f32[16,128], index: 2, kind: output, shape index: {}]  }
   0x1   :  { %8 = dma.hbm_to_smem %s783_s0, 16, %s587_s9, [#allocation4] }
   0x2   :  { %577 = dma.done.wait [#allocation4], 16 }
   0x3   :  { %578 = vsyncadd [#allocation4], 4294967280 }
   0x4   :  { %10 = sfence }
   0x5   :  { %11 = vsyncpa [#allocation7], 0  ;;  %s13_s12 = sld [smem:[#allocation5]]  ;;  %s588_s13 = smov [#allocation2]  }
   0x6   :  { %s23_s14 = sshll.u32 %s588_s13, 4  ;;  %s617_s15 = sld [smem:[#allocation5 + $0x1]]  ;;  %s619_s14 = int_to_ptr.vmem [resolvable:$true] %s23_s14 }
   0x7   :  { %s589_s16 = smov [#allocation2 + $0x1]   ;;  %s621_s18 = sld [smem:[#allocation5 + $0x2]] }
   0x8   :  { %s40_s17 = sshll.u32 %s589_s16, 4  ;;  %s590_s19 = smov [#allocation2 + $0x2]   ;;  %s623_s17 = int_to_ptr.vmem [resolvable:$true] %s40_s17 }
   0x9   :  { %s57_s0 = sshll.u32 %s590_s19, 4  ;;  %s625_s20 = sld [smem:[#allocation5 + $0x3]]  ;;  %s627_s0 = int_to_ptr.vmem [resolvable:$true] %s57_s0 }
   0xa   :  { %s636_s29 = scalar_lea.hbm %s784_s1, 1024 }
   0xb   :  { %s290_s21 = sshll.u32 %s13_s12, 4 }
   0xc   :  { %s15_s24 = scalar_lea.hbm %s784_s1, %s290_s21  ;;  %s292_s25 = sshll.u32 %s617_s15, 4 }
   0xd   :  { %s351_s26 = scalar_lea.hbm %s15_s24, 16  ;;  %p354_p1 = scmp.lt.s32.totalorder %s15_s24, %s784_s1 }
   0xe   :  { %p352_p0 = scmp.ne.s32.totalorder %s15_s24, %s351_s26  ;;  %p355_p2 = scmp.lt.s32.totalorder %s636_s29, %s351_s26 }
  0x10   :  { %p356_p3 = por %p355_p2, %p354_p1 }
  0x12   :  { %p357_p4 = pnand %p356_p3, %p352_p0 }
  0x14   :  { %360 = shalt.err (!%p357_p4)  }
  0x15   :  { %s361_s4 = scalar_lea.vmem %s619_s14, 16  ;;  %s645_s5 = scalar_lea.vmem %s619_s14, 256 }
  0x16   :  { %p362_p5 = scmp.ne.s32.totalorder %s619_s14, %s361_s4  ;;  %p366_p6 = scmp.lt.s32.totalorder %s619_s14, %s619_s14 }
  0x17   :  { %p367_p7 = scmp.lt.s32.totalorder %s645_s5, %s361_s4 }
  0x19   :  { %p368_p8 = por %p367_p7, %p366_p6 }
  0x1b   :  { %p369_p9 = pnand %p368_p8, %p362_p5 }
  0x1d   :  { %372 = shalt.err (!%p369_p9)  }
  0x1e   :  { %26 = dma.hbm_to_vmem [thread:$0]  %s15_s24, 16, %s619_s14, [#allocation3] }
  0x1f   :  { %s30_s8 = scalar_lea.hbm %s784_s1, %s292_s25  ;;  %s294_s9 = sshll.u32 %s621_s18, 4 }
  0x20   :  { %s373_s10 = scalar_lea.hbm %s30_s8, 16  ;;  %p376_p11 = scmp.lt.s32.totalorder %s30_s8, %s784_s1 }
  0x21   :  { %p374_p10 = scmp.ne.s32.totalorder %s30_s8, %s373_s10  ;;  %p377_p12 = scmp.lt.s32.totalorder %s636_s29, %s373_s10 }
  0x23   :  { %p378_p13 = por %p377_p12, %p376_p11 }
  0x25   :  { %p379_p0 = pnand %p378_p13, %p374_p10 }
  0x27   :  { %382 = shalt.err (!%p379_p0)  }
  0x28   :  { %s383_s13 = scalar_lea.vmem %s623_s17, 16  ;;  %p388_p2 = scmp.lt.s32.totalorder %s623_s17, %s619_s14 }
  0x29   :  { %p384_p1 = scmp.ne.s32.totalorder %s623_s17, %s383_s13  ;;  %p389_p3 = scmp.lt.s32.totalorder %s645_s5, %s383_s13 }
  0x2b   :  { %p390_p4 = por %p389_p3, %p388_p2 }
  0x2d   :  { %p391_p5 = pnand %p390_p4, %p384_p1 }
  0x2f   :  { %394 = shalt.err (!%p391_p5)  }
  0x30   :  { %43 = dma.hbm_to_vmem [thread:$0]  %s30_s8, 16, %s623_s17, [#allocation3 + $0x1] }
  0x31   :  { %s47_s18 = scalar_lea.hbm %s784_s1, %s294_s9  ;;  %s296_s19 = sshll.u32 %s625_s20, 4 }
  0x32   :  { %s395_s21 = scalar_lea.hbm %s47_s18, 16  ;;  %p398_p7 = scmp.lt.s32.totalorder %s47_s18, %s784_s1 }
  0x33   :  { %p396_p6 = scmp.ne.s32.totalorder %s47_s18, %s395_s21  ;;  %p399_p8 = scmp.lt.s32.totalorder %s636_s29, %s395_s21 }
  0x35   :  { %p400_p9 = por %p399_p8, %p398_p7 }
  0x37   :  { %p401_p10 = pnand %p400_p9, %p396_p6 }
  0x39   :  { %404 = shalt.err (!%p401_p10)  }
  0x3a   :  { %s405_s17 = scalar_lea.vmem %s627_s0, 16  ;;  %p410_p12 = scmp.lt.s32.totalorder %s627_s0, %s619_s14 }
  0x3b   :  { %p406_p11 = scmp.ne.s32.totalorder %s627_s0, %s405_s17  ;;  %p411_p13 = scmp.lt.s32.totalorder %s645_s5, %s405_s17 }
  0x3d   :  { %p412_p0 = por %p411_p13, %p410_p12 }
  0x3f   :  { %p413_p1 = pnand %p412_p0, %p406_p11 }
  0x41   :  { %416 = shalt.err (!%p413_p1)  }
  0x42   :  { %60 = dma.hbm_to_vmem [thread:$0]  %s47_s18, 16, %s627_s0, [#allocation3 + $0x2] }
  0x43   :  { %s64_s25 = scalar_lea.hbm %s784_s1, %s296_s19  ;;  %s591_s26 = smov [#allocation2 + $0x3]  }
  0x44   :  { %s74_s27 = sshll.u32 %s591_s26, 4  ;;  %s297_s28 = sld [smem:[#allocation5 + $0x4]]  ;;  %s75_s27 = int_to_ptr.vmem [resolvable:$true] %s74_s27 }
  0x45   :  { %s417_s30 = scalar_lea.hbm %s64_s25, 16  ;;  %p420_p3 = scmp.lt.s32.totalorder %s64_s25, %s784_s1 }
  0x46   :  { %p418_p2 = scmp.ne.s32.totalorder %s64_s25, %s417_s30  ;;  %p421_p4 = scmp.lt.s32.totalorder %s636_s29, %s417_s30 }
  0x48   :  { %p422_p5 = por %p421_p4, %p420_p3 }
  0x4a   :  { %p423_p6 = pnand %p422_p5, %p418_p2 }
  0x4c   :  { %426 = shalt.err (!%p423_p6)  }
  0x4d   :  { %s427_s6 = scalar_lea.vmem %s75_s27, 16  ;;  %p432_p8 = scmp.lt.s32.totalorder %s75_s27, %s619_s14 }
  0x4e   :  { %p428_p7 = scmp.ne.s32.totalorder %s75_s27, %s427_s6  ;;  %p433_p9 = scmp.lt.s32.totalorder %s645_s5, %s427_s6 }
  0x50   :  { %p434_p10 = por %p433_p9, %p432_p8 }
  0x52   :  { %p435_p11 = pnand %p434_p10, %p428_p7 }
  0x54   :  { %438 = shalt.err (!%p435_p11)  }
  0x55   :  { %77 = dma.hbm_to_vmem [thread:$0]  %s64_s25, 16, %s75_s27, [#allocation3 + $0x3] }
  0x56   :  { %s592_s0 = smov [#allocation2 + $0x4]   ;;  %s299_s8 = sld [smem:[#allocation5 + $0x5]] }
  0x57   :  { %s91_s7 = sshll.u32 %s592_s0, 4  ;;  %s593_s9 = smov [#allocation2 + $0x5]   ;;  %s92_s7 = int_to_ptr.vmem [resolvable:$true] %s91_s7 }
  0x58   :  { %s108_s10 = sshll.u32 %s593_s9, 4  ;;  %s688_s11 = sld [smem:[#allocation5 + $0x6]]  ;;  %s690_s10 = int_to_ptr.vmem [resolvable:$true] %s108_s10 }
  0x59   :  { %s298_s12 = sshll.u32 %s297_s28, 4 }
  0x5a   :  { %s81_s16 = scalar_lea.hbm %s784_s1, %s298_s12 }
  0x5b   :  { %s439_s18 = scalar_lea.hbm %s81_s16, 16  ;;  %p442_p13 = scmp.lt.s32.totalorder %s81_s16, %s784_s1 }
  0x5c   :  { %p440_p12 = scmp.ne.s32.totalorder %s81_s16, %s439_s18  ;;  %p443_p0 = scmp.lt.s32.totalorder %s636_s29, %s439_s18 }
  0x5e   :  { %p444_p1 = por %p443_p0, %p442_p13 }
  0x60   :  { %p445_p2 = pnand %p444_p1, %p440_p12 }
  0x62   :  { %448 = shalt.err (!%p445_p2)  }
  0x63   :  { %s449_s22 = scalar_lea.vmem %s92_s7, 16  ;;  %p454_p4 = scmp.lt.s32.totalorder %s92_s7, %s619_s14 }
  0x64   :  { %p450_p3 = scmp.ne.s32.totalorder %s92_s7, %s449_s22  ;;  %p455_p5 = scmp.lt.s32.totalorder %s645_s5, %s449_s22 }
  0x66   :  { %p456_p6 = por %p455_p5, %p454_p4 }
  0x68   :  { %p457_p7 = pnand %p456_p6, %p450_p3 }
  0x6a   :  { %460 = shalt.err (!%p457_p7)  }
  0x6b   :  { %94 = dma.hbm_to_vmem [thread:$0]  %s81_s16, 16, %s92_s7, [#allocation3 + $0x4] }
  0x6c   :  { %s300_s23 = sshll.u32 %s299_s8, 4  ;;  %s594_s17 = smov [#allocation2 + $0x6]  }
  0x6d   :  { %s125_s20 = sshll.u32 %s594_s17, 4  ;;  %s98_s26 = scalar_lea.hbm %s784_s1, %s300_s23  ;;  %s704_s20 = int_to_ptr.vmem [resolvable:$true] %s125_s20 }
  0x6e   :  { %s461_s27 = scalar_lea.hbm %s98_s26, 16  ;;  %p464_p9 = scmp.lt.s32.totalorder %s98_s26, %s784_s1 }
  0x6f   :  { %p462_p8 = scmp.ne.s32.totalorder %s98_s26, %s461_s27  ;;  %p465_p10 = scmp.lt.s32.totalorder %s636_s29, %s461_s27 }
  0x71   :  { %p466_p11 = por %p465_p10, %p464_p9 }
  0x73   :  { %p467_p12 = pnand %p466_p11, %p462_p8 }
  0x75   :  { %470 = shalt.err (!%p467_p12)  }
  0x76   :  { %s471_s3 = scalar_lea.vmem %s690_s10, 16  ;;  %p476_p0 = scmp.lt.s32.totalorder %s690_s10, %s619_s14 }
  0x77   :  { %p472_p13 = scmp.ne.s32.totalorder %s690_s10, %s471_s3  ;;  %p477_p1 = scmp.lt.s32.totalorder %s645_s5, %s471_s3 }
  0x79   :  { %p478_p2 = por %p477_p1, %p476_p0 }
  0x7b   :  { %p479_p3 = pnand %p478_p2, %p472_p13 }
  0x7d   :  { %482 = shalt.err (!%p479_p3)  }
  0x7e   :  { %111 = dma.hbm_to_vmem [thread:$0]  %s98_s26, 16, %s690_s10, [#allocation3 + $0x5] }
  0x7f   :  { %s302_s4 = sshll.u32 %s688_s11, 4  ;;  %s303_s6 = sld [smem:[#allocation5 + $0x7]] }
  0x80   :  { %s115_s8 = scalar_lea.hbm %s784_s1, %s302_s4 }
  0x81   :  { %s483_s9 = scalar_lea.hbm %s115_s8, 16  ;;  %p486_p5 = scmp.lt.s32.totalorder %s115_s8, %s784_s1 }
  0x82   :  { %p484_p4 = scmp.ne.s32.totalorder %s115_s8, %s483_s9  ;;  %p487_p6 = scmp.lt.s32.totalorder %s636_s29, %s483_s9 }
  0x84   :  { %p488_p7 = por %p487_p6, %p486_p5 }
  0x86   :  { %p489_p8 = pnand %p488_p7, %p484_p4 }
  0x88   :  { %492 = shalt.err (!%p489_p8)  }
  0x89   :  { %s493_s10 = scalar_lea.vmem %s704_s20, 16  ;;  %p498_p10 = scmp.lt.s32.totalorder %s704_s20, %s619_s14 }
  0x8a   :  { %p494_p9 = scmp.ne.s32.totalorder %s704_s20, %s493_s10  ;;  %p499_p11 = scmp.lt.s32.totalorder %s645_s5, %s493_s10 }
  0x8c   :  { %p500_p12 = por %p499_p11, %p498_p10 }
  0x8e   :  { %p501_p13 = pnand %p500_p12, %p494_p9 }
  0x90   :  { %504 = shalt.err (!%p501_p13)  }
  0x91   :  { %128 = dma.hbm_to_vmem [thread:$0]  %s115_s8, 16, %s704_s20, [#allocation3 + $0x6] }
  0x92   :  { %s595_s11 = smov [#allocation2 + $0x7]   ;;  %s304_s16 = sshll.u32 %s303_s6, 4 }
  0x93   :  { %s142_s15 = sshll.u32 %s595_s11, 4  ;;  %s132_s21 = scalar_lea.hbm %s784_s1, %s304_s16  ;;  %s143_s15 = int_to_ptr.vmem [resolvable:$true] %s142_s15 }
  0x94   :  { %s505_s22 = scalar_lea.hbm %s132_s21, 16  ;;  %p508_p1 = scmp.lt.s32.totalorder %s132_s21, %s784_s1 }
  0x95   :  { %p506_p0 = scmp.ne.s32.totalorder %s132_s21, %s505_s22  ;;  %p509_p2 = scmp.lt.s32.totalorder %s636_s29, %s505_s22 }
  0x97   :  { %p510_p3 = por %p509_p2, %p508_p1 }
  0x99   :  { %p511_p4 = pnand %p510_p3, %p506_p0 }
  0x9b   :  { %514 = shalt.err (!%p511_p4)  }
  0x9c   :  { %s515_s24 = scalar_lea.vmem %s143_s15, 16  ;;  %p520_p6 = scmp.lt.s32.totalorder %s143_s15, %s619_s14 }
  0x9d   :  { %p516_p5 = scmp.ne.s32.totalorder %s143_s15, %s515_s24  ;;  %p521_p7 = scmp.lt.s32.totalorder %s645_s5, %s515_s24 }
  0x9f   :  { %p522_p8 = por %p521_p7, %p520_p6 }
  0xa1   :  { %p523_p9 = pnand %p522_p8, %p516_p5 }
  0xa3   :  { %526 = shalt.err (!%p523_p9)  }
  0xa4   :  { %145 = dma.hbm_to_vmem [thread:$0]  %s132_s21, 16, %s143_s15, [#allocation3 + $0x7] }
  0xa5   :  { %s739_s20 = smov 0  }
  0xa6 LB: > { %p152_p10 = scmp.lt.s32.totalorder %s585_s20, 0  ;;  %s153_s25 = ssub.s32 0, %s585_s20  ;;  %s585_s20 = sphi %s739_s20, %s151_s20  }
  0xa7   : > { %s305_s26 = smin.u32 %s585_s20, %s153_s25 }
  0xa8   : > { %s155_s27 = sand.u32 7, %s305_s26  }
  0xa9   : > { %s156_s28 = ssub.s32 0, %s155_s27 }
  0xaa   : > { %s788_s28 = smov (!%p152_p10, %s156_s28), %s155_s27 }
  0xab   : > { %p307_p11 = scmp.lt.s32.totalorder %s788_s28, 0  ;;  %s162_s30 = sadd.s32 8, %s788_s28 }
  0xad   : > { %s790_s30 = smov (!%p307_p11, %s162_s30), %s788_s28 }
  0xae   : > { %s747_s3 = scalar_lea.sflag [#allocation3], %s790_s30 }
  0xaf   : > { %579 = dma.done.wait %s747_s3, 16 }
  0xb0   : > { %580 = vsyncadd %s747_s3, 4294967280  ;;  %s168_s4 = sadd.s32 8, %s585_s20  ;;  %s283_s7 = scalar_lea.vmem [#allocation2], %s585_s20 }
  0xb1   : > { %p752_p12 = scmp.lt.s32.totalorder %s168_s4, 16  ;;  %s284_s8 = scalar_lea.vmem %s283_s7, 8 [#allocation2] }
  0xb2   : > { %s185_s12 = sshll.u32 %s284_s8, 4  ;;  %s186_s12 = int_to_ptr.vmem [resolvable:$true] %s185_s12 }
  0xb3   : > { %s319_s0 = scalar_select %p752_p12, [#allocation5], [#allocation28] }
  0xb4   : > { %s792_s4 = smov (!%p752_p12, %s168_s4), 0 }
  0xb5   : > { %s174_s9 = sld [smem:[%s319_s0 + %s792_s4]] }
  0xbb   : > { %s309_s13 = sshll.u32 %s174_s9, 4 }
  0xbc   : > { %s176_s15 = scalar_lea.hbm %s784_s1, %s309_s13 }
  0xbd   : > { %s527_s16 = scalar_lea.hbm %s176_s15, 16  ;;  %p532_p2 = scmp.lt.s32.totalorder %s176_s15, %s784_s1 }
  0xbe   : > { %p528_p13 = scmp.ne.s32.totalorder %s176_s15, %s527_s16  ;;  %p533_p3 = scmp.lt.s32.totalorder %s636_s29, %s527_s16 }
  0xc0   : > { %p529_p0 = pnand %p528_p13, %p752_p12  ;;  %p534_p4 = por %p533_p3, %p532_p2 }
  0xc2   : > { %p530_p1 = pneg %p529_p0 }
  0xc4   : > { %p535_p5 = pnand %p534_p4, %p530_p1 }
  0xc6   : > { %538 = shalt.err (!%p535_p5)  }
  0xc7   : > { %s539_s21 = scalar_lea.vmem %s186_s12, 16  ;;  %p546_p9 = scmp.lt.s32.totalorder %s186_s12, %s619_s14 }
  0xc8   : > { %p540_p6 = scmp.ne.s32.totalorder %s186_s12, %s539_s21  ;;  %p547_p10 = scmp.lt.s32.totalorder %s645_s5, %s539_s21 }
  0xca   : > { %p541_p7 = pnand %p540_p6, %p752_p12  ;;  %p548_p11 = por %p547_p10, %p546_p9 }
  0xcc   : > { %p542_p8 = pneg %p541_p7 }
  0xce   : > { %p549_p13 = pnand %p548_p11, %p542_p8 }
  0xd0   : > { %552 = shalt.err (!%p549_p13)  }
  0xd1   : > { %321 = dma.hbm_to_vmem [thread:$0]  (%p752_p12), %s176_s15, 16, %s186_s12, %s747_s3 }
  0xd2   : > { %s151_s20 = sadd.s32 1, %s585_s20  }
  0xd3   : > { %p148_p0 = scmp.ge.s32.totalorder %s151_s20, 16  }
  0xd4   :  { %v189_v0 = vld [vmem:[#allocation2] sm:$0xff] (%p148_p0)  ;;  %v190_v1 = vld [vmem:[#allocation2 + $0x8] sm:$0xff] (%p148_p0)  ;;  %s596_s22 = smov (%p148_p0), [#allocation6]  }
  0xd5   :  { %150 = sbr.rel (!%p148_p0) target bundleno = 166 (0xa6), region = 99  ;;  %191 = vst [vmem:[#allocation6] sm:$0xff] (%p148_p0), %v189_v0  ;;  %192 = vst [vmem:[#allocation6 + $0x8] sm:$0xff] (%p148_p0), %v190_v1  ;;  %s198_s23 = sshll.u32 (%p148_p0), %s596_s22, 4  ;;  %s199_s23 = int_to_ptr.vmem [resolvable:$true] %s198_s23 }
  0xd6   :  { %s553_s17 = scalar_lea.vmem (%p148_p0), %s199_s23, 256  ;;  %p558_p2 = scmp.lt.s32.totalorder (%p148_p0), %s199_s23, %s199_s23 }
  0xd7   :  { %p554_p1 = scmp.ne.s32.totalorder (%p148_p0), %s199_s23, %s553_s17  ;;  %p559_p3 = scmp.lt.s32.totalorder (%p148_p0), %s553_s17, %s553_s17 }
  0xd9   :  { %p560_p4 = por (%p148_p0), %p559_p3, %p558_p2 }
  0xdb   :  { %p561_p5 = pnand %p560_p4, %p554_p1 }
  0xdd   :  { %564 = shalt.err (!%p561_p5)
}
  0xde   :  { %s597_s24 = smov 128   ;;  %s598_s25 = smov 8  }
  0xdf   :  { %204 = dma.vmem_to_hbm [thread:$0]  %s199_s23, 256, %s785_s2, [#allocation7], %s597_s24, %s597_s24, %s598_s25  }
  0xe0   :  { %581 = dma.done.wait [#allocation7], 256  }
  0xe1   :  { %582 = vsyncadd [#allocation7], 4294967040 }
  0xe2   :  { %208 = vsyncpa [#allocation7], 1 }
  0xe3   :  { %209 = vsyncmov [#allocation3] }
  0xe6   :  { %s210_s1 = vpop.sfrf %209 }
  0xe7   :  { %p310_p12 = scmp.ne.s32.totalorder %s210_s1, 0 }
  0xe9   :  { %214 = shalt.err (%p310_p12)  }
  0xea   :  { %216 = vsyncmov [#allocation3 + $0x1] }
  0xed   :  { %s217_s14 = vpop.sfrf %216 }
  0xee   :  { %p311_p6 = scmp.ne.s32.totalorder %s217_s14, 0 }
  0xf0   :  { %221 = shalt.err (%p311_p6)  }
  0xf1   :  { %223 = vsyncmov [#allocation3 + $0x2] }
  0xf4   :  { %s224_s29 = vpop.sfrf %223 }
  0xf5   :  { %p312_p7 = scmp.ne.s32.totalorder %s224_s29, 0 }
  0xf7   :  { %228 = shalt.err (%p312_p7)  }
  0xf8   :  { %230 = vsyncmov [#allocation3 + $0x3] }
  0xfb   :  { %s231_s5 = vpop.sfrf %230 }
  0xfc   :  { %p313_p8 = scmp.ne.s32.totalorder %s231_s5, 0 }
  0xfe   :  { %235 = shalt.err (%p313_p8)  }
  0xff   :  { %237 = vsyncmov [#allocation3 + $0x4] }
 0x102   :  { %s238_s2 = vpop.sfrf %237 }
 0x103   :  { %p314_p9 = scmp.ne.s32.totalorder %s238_s2, 0 }
 0x105   :  { %242 = shalt.err (%p314_p9)  }
 0x106   :  { %244 = vsyncmov [#allocation3 + $0x5] }
 0x109   :  { %s245_s20 = vpop.sfrf %244 }
 0x10a   :  { %p315_p10 = scmp.ne.s32.totalorder %s245_s20, 0 }
 0x10c   :  { %249 = shalt.err (%p315_p10)  }
 0x10d   :  { %251 = vsyncmov [#allocation3 + $0x6] }
 0x110   :  { %s252_s28 = vpop.sfrf %251 }
 0x111   :  { %p316_p11 = scmp.ne.s32.totalorder %s252_s28, 0 }
 0x113   :  { %256 = shalt.err (%p316_p11)  }
 0x114   :  { %258 = vsyncmov [#allocation3 + $0x7] }
 0x117   :  { %s259_s30 = vpop.sfrf %258 }
 0x118   :  { %p317_p13 = scmp.ne.s32.totalorder %s259_s30, 0 }
 0x11a   :  { %263 = shalt.err (%p317_p13)  }

</bundles_post_ra>
